<compile_context>
chip_gen: v5e
topology: v5e:2x2
jax: 0.10.0
libtpu: 0.0.40
codegen_flags: <defaults>
</compile_context>

<pallas_src>
import functools

import jax
import jax.numpy as jnp
from jax.experimental import pallas as pl
from jax.experimental.pallas import tpu as pltpu


def se_block_kernel(x_ref, w1t_ref, w2t_ref, alpha_ref, o_ref, *,
                    inv_hw, channels_last, scale_in_input_dtype):
    # x_ref:     (Nb, C, HW) or (Nb, HW, C) input tile
    # w1t_ref:   (C, Cr)  transpose of conv1 weight (Cr, C, 1, 1)
    # w2t_ref:   (Cr, C)  transpose of conv2 weight (C, Cr, 1, 1)
    # alpha_ref: (1,) SMEM PReLU slope (PyTorch default num_parameters=1)
    # TODO(synk): per-channel PReLU (num_parameters=Cr) would need a (1, Cr)
    # vector broadcast here instead of the shared scalar slope.
    x = x_ref[...]

    # Squeeze: AdaptiveAvgPool2d(1) == spatial mean; accumulate in f32.
    pool_axis = -2 if channels_last else -1
    pooled = jnp.sum(x, axis=pool_axis, dtype=jnp.float32) * inv_hw   # (Nb, C)

    # Excitation: 1x1 conv (no bias) -> PReLU -> 1x1 conv (no bias) -> sigmoid.
    h = jnp.dot(pooled, w1t_ref[...],
                preferred_element_type=jnp.float32)                  # (Nb, Cr)
    alpha = alpha_ref[0]
    h = jnp.where(h >= 0, h, alpha * h)
    s = jax.nn.sigmoid(
        jnp.dot(h, w2t_ref[...], preferred_element_type=jnp.float32))  # (Nb, C)

    if scale_in_input_dtype:
        s = s.astype(x.dtype)

    # Scale: broadcast gate over the spatial extent and multiply.
    if channels_last:
        o_ref[...] = (x * s[:, None, :]).astype(o_ref.dtype)
    else:
        o_ref[...] = (x * s[:, :, None]).astype(o_ref.dtype)


def _device_info():
    """(num_tensorcores, vmem cap in bytes, is_v5e) from the local device kind."""
    kind = ""
    try:
        kind = jax.devices()[0].device_kind.lower()
    except Exception:
        pass
    is_v7 = ("v7" in kind) or ("7x" in kind)
    is_v5e = ("v5 lite" in kind) or ("v5e" in kind) or ("v5litepod" in kind)
    num_tc = 2 if is_v7 else 1
    # Leave headroom below physical VMEM: 64 MiB on v7x -> cap 48 MiB;
    # 128 MiB on v5e/v6e -> cap 100 MiB.
    vmem_cap = (48 << 20) if is_v7 else (100 << 20)
    return num_tc, vmem_cap, is_v5e


def _lane_occupancy(d):
    """Fraction of the last-dim vreg lanes actually used by a size-d dim."""
    return d / (pl.cdiv(d, 128) * 128)


def _choose_batch_block(n, per_elem_bytes, target_bytes, num_cores):
    """Pick rows-per-block from a byte budget; n need not be divisible."""
    nb = max(1, min(n, int(target_bytes // max(per_elem_bytes, 1))))
    steps = pl.cdiv(n, nb)
    if num_cores > 1 and steps % num_cores != 0:
        # Round the step count up to a multiple of the TC count and rebalance
        # so both cores stream data on every pair of steps.
        steps = pl.cdiv(steps, num_cores) * num_cores
        nb = pl.cdiv(n, steps)
    return nb


def se_block(x, w1, w2, alpha, *, target_block_bytes=8 << 20,
             vmem_limit_bytes=None):
    """x: (N, C, H, W); w1: (Cr, C); w2: (C, Cr); alpha: scalar PReLU slope."""
    N, C, H, W = x.shape
    HW = H * W
    Cr = w1.shape[0]

    num_tc, vmem_cap, is_v5e = _device_info()

    # Shape-aware layout: put whichever of {HW, C} fills lanes better last.
    channels_last = _lane_occupancy(C) > _lane_occupancy(HW)
    if channels_last:
        x2 = jnp.transpose(x, (0, 2, 3, 1)).reshape(N, HW, C)   # (N, HW, C)
        block_tail = (HW, C)
    else:
        x2 = x.reshape(N, C, HW)                                # (N, C, HW)
        block_tail = (C, HW)

    w1t = jnp.transpose(w1).astype(jnp.float32)                 # (C, Cr)
    w2t = jnp.transpose(w2).astype(jnp.float32)                 # (Cr, C)
    alpha1 = jnp.reshape(alpha, (1,)).astype(jnp.float32)

    per_elem_bytes = C * HW * x.dtype.itemsize
    nb = _choose_batch_block(N, per_elem_bytes, target_block_bytes, num_tc)
    grid = (pl.cdiv(N, nb),)

    if vmem_limit_bytes is None:
        block_bytes = nb * per_elem_bytes
        weight_bytes = 2 * C * Cr * 4
        # input + output double-buffered (4x block) + weights + 2 MiB headroom,
        # capped under the physical VMEM; >=32 MiB floor so v5e's 16 MiB
        # scoped default doesn't block 8 MiB pipelined tiles.
        vmem_limit_bytes = min(
            vmem_cap,
            max(32 << 20, 4 * block_bytes + 2 * weight_bytes + (2 << 20)))

    # Cast the gate to the input dtype for the big multiply only on chips with
    # low-precision VALU support (not v5e) and only for sub-f32 inputs.
    scale_in_input_dtype = (x.dtype != jnp.float32) and (not is_v5e)

    kernel = functools.partial(
        se_block_kernel,
        inv_hw=1.0 / HW,
        channels_last=channels_last,
        scale_in_input_dtype=scale_in_input_dtype)

    out = pl.pallas_call(
        kernel,
        out_shape=jax.ShapeDtypeStruct((N,) + block_tail, x.dtype),
        grid_spec=pltpu.PrefetchScalarGridSpec(
            num_scalar_prefetch=0,
            grid=grid,
            in_specs=[
                pl.BlockSpec((nb,) + block_tail, lambda n: (n, 0, 0)),
                pl.BlockSpec((C, Cr), lambda n: (0, 0)),
                pl.BlockSpec((Cr, C), lambda n: (0, 0)),
                pl.BlockSpec(memory_space=pltpu.MemorySpace.SMEM),
            ],
            out_specs=pl.BlockSpec((nb,) + block_tail, lambda n: (n, 0, 0)),
        ),
        compiler_params=pltpu.CompilerParams(
            dimension_semantics=("parallel",),
            vmem_limit_bytes=int(vmem_limit_bytes)),
    )(x2, w1t, w2t, alpha1)

    if channels_last:
        return jnp.transpose(out.reshape(N, H, W, C), (0, 3, 1, 2))
    return out.reshape(N, C, H, W)

    # NOTE: for H*W too large for the VMEM budget, the right restructure is a
    # spatially-tiled two-phase grid (accumulate pooled sums over an
    # "arbitrary" spatial axis, excite + scale on the final tile) so x is
    # still read/written exactly once; not needed at these sizes.


def se_block_ref(x, w1, w2, alpha):
    """Pure-JAX reference mirroring the PyTorch module (f32 math)."""
    xf = x.astype(jnp.float32)
    pooled = jnp.mean(xf, axis=(2, 3))                          # (N, C)
    h = pooled @ w1.T.astype(jnp.float32)                       # (N, Cr)
    h = jnp.where(h >= 0, h, alpha * h)
    s = jax.nn.sigmoid(h @ w2.T.astype(jnp.float32))            # (N, C)
    return (xf * s[:, :, None, None]).astype(x.dtype)


def _run_case(key, n, c, h, w, reduction, dtype, atol, rtol):
    cr = max(1, c // reduction)
    kx, k1, k2 = jax.random.split(key, 3)
    x = jax.random.normal(kx, (n, c, h, w), dtype=jnp.float32).astype(dtype)
    # Conv weights are (out, in, 1, 1) in PyTorch; kernel dims squeezed here.
    w1 = 0.1 * jax.random.normal(k1, (cr, c), dtype=jnp.float32)
    w2 = 0.1 * jax.random.normal(k2, (c, cr), dtype=jnp.float32)
    alpha = jnp.array(0.25, dtype=jnp.float32)                  # PReLU default

    out = jax.block_until_ready(se_block(x, w1, w2, alpha))
    ref = se_block_ref(x, w1, w2, alpha)

    assert out.shape == x.shape and out.dtype == x.dtype
    assert jnp.allclose(out.astype(jnp.float32), ref.astype(jnp.float32),
                        atol=atol, rtol=rtol), (n, c, h, w, dtype)


if __name__ == "__main__":
    key = jax.random.PRNGKey(0)
    k0, k1, k2 = jax.random.split(key, 3)

    # HW multiple of 128 -> (N, C, HW) lane-dense path.
    _run_case(k0, n=2, c=64, h=16, w=16, reduction=16,
              dtype=jnp.float32, atol=1e-5, rtol=1e-5)
    # 7x7 SE shape -> channel-last (N, HW, C) path (HW=49 would waste lanes).
    _run_case(k1, n=4, c=128, h=7, w=7, reduction=16,
              dtype=jnp.float32, atol=1e-5, rtol=1e-5)
    # bf16 input: f32 pooling accumulation + gated low-precision scale.
    _run_case(k2, n=2, c=64, h=16, w=16, reduction=16,
              dtype=jnp.bfloat16, atol=2e-2, rtol=2e-2)

    print("KERNEL_OK")
</pallas_src>

<mosaic_0001>
module attributes {stable_mosaic.version = 11 : i64} {
  func.func @se_block_kernel(%arg0: i32, %arg1: memref<2x64x256xf32, #tpu.memory_space<vmem>>, %arg2: memref<64x4xf32, #tpu.memory_space<vmem>>, %arg3: memref<4x64xf32, #tpu.memory_space<vmem>>, %arg4: memref<1xf32, #tpu.memory_space<smem>>, %arg5: memref<2x64x256xf32, #tpu.memory_space<vmem>>) attributes {dimension_semantics = [#tpu.dimension_semantics<parallel>], iteration_bounds = array<i64: 1>, scalar_prefetch = 0 : i64, scratch_operands = 0 : i64, tpu.core_type = #tpu.core_type<tc>, window_params = [{transform_indices = @transform_0, window_bounds = array<i64: 2, 64, 256>}, {pipeline_mode = #tpu.pipeline_mode<synchronous>, transform_indices = @transform_1, window_bounds = array<i64: 64, 4>}, {pipeline_mode = #tpu.pipeline_mode<synchronous>, transform_indices = @transform_2, window_bounds = array<i64: 4, 64>}, {transform_indices = @transform_3, window_bounds = array<i64: 1>}, {transform_indices = @transform_4, window_bounds = array<i64: 2, 64, 256>}]} {
    %c0 = arith.constant 0 : index
    %c0_0 = arith.constant 0 : index
    %c0_1 = arith.constant 0 : index
    %0 = vector.load %arg1[%c0, %c0_0, %c0_1] : memref<2x64x256xf32, #tpu.memory_space<vmem>>, vector<2x64x256xf32>
    %cst = arith.constant dense<0.000000e+00> : vector<2x64xf32>
    %1 = vector.multi_reduction <add>, %0, %cst [2] : vector<2x64x256xf32> to vector<2x64xf32>
    %cst_2 = arith.constant 3.906250e-03 : f32
    %2 = vector.broadcast %cst_2 : f32 to vector<2x64xf32>
    %3 = arith.mulf %1, %2 : vector<2x64xf32>
    %c0_3 = arith.constant 0 : index
    %c0_4 = arith.constant 0 : index
    %4 = vector.load %arg2[%c0_3, %c0_4] : memref<64x4xf32, #tpu.memory_space<vmem>>, vector<64x4xf32>
    %cst_5 = arith.constant dense<0.000000e+00> : vector<2x4xf32>
    %5 = tpu.matmul %3, %4, %cst_5 {dimension_numbers = #tpu.dot_dimension_numbers<[1], [0], [0], [1], [0, 0, 1, 1], [], []>} : vector<2x64xf32>, vector<64x4xf32>, vector<2x4xf32> -> vector<2x4xf32>
    %c0_6 = arith.constant 0 : index
    %6 = memref.load %arg4[%c0_6] : memref<1xf32, #tpu.memory_space<smem>>
    %cst_7 = arith.constant 0.000000e+00 : f32
    %7 = vector.broadcast %cst_7 : f32 to vector<2x4xf32>
    %8 = arith.cmpf oge, %5, %7 : vector<2x4xf32>
    %9 = vector.broadcast %6 : f32 to vector<2x4xf32>
    %10 = arith.mulf %9, %5 : vector<2x4xf32>
    %11 = arith.select %8, %5, %10 : vector<2x4xi1>, vector<2x4xf32>
    %c0_8 = arith.constant 0 : index
    %c0_9 = arith.constant 0 : index
    %12 = vector.load %arg3[%c0_8, %c0_9] : memref<4x64xf32, #tpu.memory_space<vmem>>, vector<4x64xf32>
    %cst_10 = arith.constant dense<0.000000e+00> : vector<2x64xf32>
    %13 = tpu.matmul %11, %12, %cst_10 {dimension_numbers = #tpu.dot_dimension_numbers<[1], [0], [0], [1], [0, 0, 1, 1], [], []>} : vector<2x4xf32>, vector<4x64xf32>, vector<2x64xf32> -> vector<2x64xf32>
    %14 = arith.negf %13 : vector<2x64xf32>
    %15 = math.exp %14 : vector<2x64xf32>
    %cst_11 = arith.constant 1.000000e+00 : f32
    %16 = vector.broadcast %cst_11 : f32 to vector<2x64xf32>
    %17 = arith.addf %16, %15 : vector<2x64xf32>
    %18 = arith.divf %16, %17 : vector<2x64xf32>
    %19 = vector.shape_cast %18 : vector<2x64xf32> to vector<2x64x1xf32>
    %20 = vector.broadcast %19 : vector<2x64x1xf32> to vector<2x64x256xf32>
    %21 = arith.mulf %0, %20 : vector<2x64x256xf32>
    %c0_12 = arith.constant 0 : index
    %c0_13 = arith.constant 0 : index
    %c0_14 = arith.constant 0 : index
    %22 = vector.load %arg5[%c0_12, %c0_13, %c0_14] : memref<2x64x256xf32, #tpu.memory_space<vmem>>, vector<2x64x256xf32>
    tpu.vector_store %arg5[%c0_12, %c0_13, %c0_14], %21 {strides = array<i32>} : memref<2x64x256xf32, #tpu.memory_space<vmem>>, vector<2x64x256xf32>,
    return
  }
  func.func @transform_0(%arg0: i32) -> (i32, i32, i32) {
    %c0_i32 = arith.constant 0 : i32
    %c0_i32_0 = arith.constant 0 : i32
    %c0_i32_1 = arith.constant 0 : i32
    return %arg0, %c0_i32, %c0_i32_0 : i32, i32, i32
  }
  func.func @transform_1(%arg0: i32) -> (i32, i32) {
    %c0_i32 = arith.constant 0 : i32
    %c0_i32_0 = arith.constant 0 : i32
    %c0_i32_1 = arith.constant 0 : i32
    return %c0_i32, %c0_i32_0 : i32, i32
  }
  func.func @transform_2(%arg0: i32) -> (i32, i32) {
    %c0_i32 = arith.constant 0 : i32
    %c0_i32_0 = arith.constant 0 : i32
    %c0_i32_1 = arith.constant 0 : i32
    return %c0_i32, %c0_i32_0 : i32, i32
  }
  func.func @transform_3(%arg0: i32) -> i32 {
    %c0_i32 = arith.constant 0 : i32
    %c0_i32_0 = arith.constant 0 : i32
    return %c0_i32 : i32
  }
  func.func @transform_4(%arg0: i32) -> (i32, i32, i32) {
    %c0_i32 = arith.constant 0 : i32
    %c0_i32_0 = arith.constant 0 : i32
    %c0_i32_1 = arith.constant 0 : i32
    return %arg0, %c0_i32, %c0_i32_0 : i32, i32, i32
  }
}

</mosaic_0001>

<bundles_post_ra>
// kernel: tpu_custom_call.1
= control target key start
LH: loop header
LB: loop body
LE: loop exit
PB: predicated region body
PF: predicated region fallthrough
CT: control target
= control target key end

     0   :  { %10 = vsyncpa [#allocation4], 0  ;;  %s750_s0 = inlined_call_operand.hbm [shape: f32[2,64,256], index: 0, kind: input, shape index: {}]   ;;  %s751_s1 = inlined_call_operand.vmem [shape: f32[64,4], index: 1, kind: input, shape index: {}]   ;;  %s752_s2 = inlined_call_operand.vmem [shape: f32[4,64], index: 2, kind: input, shape index: {}]   ;;  %s753_s3 = inlined_call_operand.<no memory space> [shape: f32[1], index: 3, kind: input, shape index: {}]   ;;  %s754_s4 = inlined_call_operand.hbm [shape: f32[2,64,256], index: 4, kind: output, shape index: {}]  }
   0x1   :  { %11 = vsyncpa [#allocation5], 0  ;;  %s16_s17 = sshll.u32 %s750_s0, 4  ;;  %s541_s18 = smov [#allocation3]   ;;  %s17_s17 = int_to_ptr.hbm [resolvable:$true] %s16_s17 }
   0x2   :  { %s18_s19 = sshll.u32 %s541_s18, 4  ;;  %s542_s20 = smov 256   ;;  %s19_s19 = int_to_ptr.vmem [resolvable:$true] %s18_s19 }
   0x3   :  { %s543_s21 = smov 16  }
   0x4   :  { %24 = dma.hbm_to_vmem [thread:$0]  %s17_s17, 4096, %s19_s19, [#allocation4], %s542_s20, %s542_s20, %s543_s21  }
   0x5   :  { %537 = dma.done.wait [#allocation4], 4096  }
   0x6   :  { %538 = vsyncadd [#allocation4], 4294963200  ;;  %v576_v0 = vld [vmem:[#allocation3 + $0x80] sm:$0xff]  ;;  %v578_v1 = vld [vmem:[#allocation3 + $0x88] sm:$0xff]  ;;  %vm160_vm0 = vcmask 130112   ;;  %vm164_vm1 = vcmask 195712  }
   0x7   :  { %v580_v2 = vld [vmem:[#allocation3] sm:$0xff]  ;;  %v91_v3 = vadd.f32 %v578_v1, %v576_v0  ;;  %v584_v4 = vld [vmem:[#allocation3 + $0x8] sm:$0xff]  ;;  %v594_v9 = vld [vmem:[#allocation3 + $0x90] sm:$0xff]  ;;  %vm168_vm2 = vcmask 261312   ;;  %vm172_vm3 = vcmask 326912   ;;  %vm176_vm4 = vcmask 392512  }
   0x8   :  { %v586_v5 = vld [vmem:[#allocation3 + $0x20] sm:$0xff]  ;;  %v588_v6 = vld [vmem:[#allocation3 + $0x28] sm:$0xff]  ;;  %v67_v7 = vadd.f32 %v584_v4, %v580_v2  ;;  %v596_v10 = vld [vmem:[#allocation3 + $0x98] sm:$0xff]  ;;  %vm180_vm5 = vcmask 458112   ;;  %vm184_vm6 = vcmask 523712   ;;  %vm201_vm7 = vcmask 1041409  }
   0x9   :  { %v73_v8 = vadd.f32 %v588_v6, %v586_v5  ;;  %92 = vadd.xlane.f32.xlu1 %v91_v3  ;;  %v598_v11 = vld [vmem:[#allocation3 + $0x10] sm:$0xff]  ;;  %v600_v12 = vld [vmem:[#allocation3 + $0x18] sm:$0xff]  ;;  %v602_v13 = vld [vmem:[#allocation3 + $0xa0] sm:$0xff]  ;;  %v94_v15 = vadd.f32 %v596_v10, %v594_v9  ;;  %vm203_vm8 = vcmask 523264   ;;  %vm236_vm9 = vcmask 1043456   ;;  %s447_s16 = sshll.u32 %s754_s4, 4  ;;  %s448_s16 = int_to_ptr.hbm [resolvable:$true] %s447_s16 }
   0xa   :  { %68 = vadd.xlane.f32.xlu0 %v67_v7  ;;  %v604_v14 = vld [vmem:[#allocation3 + $0xa8] sm:$0xff]  ;;  %v70_v16 = vadd.f32 %v600_v12, %v598_v11  ;;  %v612_v18 = vld [vmem:[#allocation3 + $0xb0] sm:$0xff]  ;;  %v614_v19 = vld [vmem:[#allocation3 + $0xb8] sm:$0xff]  ;;  %v755_v7 = vlaneseq  ;;  %vm232_vm11 = vcmask 31744  }
   0xb   :  { %74 = vadd.xlane.f32.xlu2 %v73_v8  ;;  %v97_v17 = vadd.f32 %v604_v14, %v602_v13  ;;  %v616_v20 = vld [vmem:[#allocation3 + $0x30] sm:$0xff]  ;;  %v618_v21 = vld [vmem:[#allocation3 + $0x38] sm:$0xff]  ;;  %v620_v22 = vld [vmem:[#allocation3 + $0x40] sm:$0xff]  ;;  %v100_v24 = vadd.f32 %v614_v19, %v612_v18 }
   0xc   :  { %v622_v23 = vld [vmem:[#allocation3 + $0x48] sm:$0xff]  ;;  %v76_v25 = vadd.f32 %v618_v21, %v616_v20  ;;  %v630_v27 = vld [vmem:[#allocation3 + $0x50] sm:$0xff]  ;;  %v632_v28 = vld [vmem:[#allocation3 + $0x58] sm:$0xff]  ;;  %v156_v8 = vand.u32 127, %v755_v7 }
   0xd   :  { %v79_v26 = vadd.f32 %v622_v23, %v620_v22  ;;  %v634_v29 = vld [vmem:[#allocation3 + $0xc0] sm:$0xff]  ;;  %v636_v30 = vld [vmem:[#allocation3 + $0xc8] sm:$0xff]  ;;  %v638_v31 = vld [vmem:[#allocation3 + $0xd0] sm:$0xff]  ;;  %v82_v33 = vadd.f32 %v632_v28, %v630_v27 }
   0xe   :  { %758 = vst [vmem:[#allocation9_spill] sm:$0xff] %v638_v31  ;;  %v640_v32 = vld [vmem:[#allocation3 + $0xd8] sm:$0xff]  ;;  %v103_v34 = vadd.f32 %v636_v30, %v634_v29  ;;  %v648_v36 = vld [vmem:[#allocation3 + $0xe0] sm:$0xff]  ;;  %v650_v37 = vld [vmem:[#allocation3 + $0xe8] sm:$0xff] }
   0xf   :  { %759 = vst [vmem:[#allocation10_spill] sm:$0xff] %v640_v32  ;;  %v106_v35 = vadd.f32 %v640_v32, %v638_v31  ;;  %v652_v38 = vld [vmem:[#allocation3 + $0x60] sm:$0xff]  ;;  %v654_v39 = vld [vmem:[#allocation3 + $0x68] sm:$0xff]  ;;  %v656_v40 = vld [vmem:[#allocation3 + $0x70] sm:$0xff]  ;;  %v109_v42 = vadd.f32 %v650_v37, %v648_v36 }
  0x10   :  { %v658_v41 = vld [vmem:[#allocation3 + $0x78] sm:$0xff]  ;;  %v85_v43 = vadd.f32 %v654_v39, %v652_v38  ;;  %v666_v45 = vld [vmem:[#allocation3 + $0xf0] sm:$0xff]  ;;  %v136_v53 = vld [vmem:[%s751_s1 + $0x28] sm:$0xff] }
  0x11   :  { %95 = vadd.xlane.f32.xlu1 %v94_v15  ;;  %v88_v44 = vadd.f32 %v658_v41, %v656_v40  ;;  %v668_v46 = vld [vmem:[#allocation3 + $0xf8] sm:$0xff]  ;;  %v137_v52 = vld [vmem:[%s751_s1 + $0x30] sm:$0xff]  ;;  %v135_v54 = vld [vmem:[%s751_s1 + $0x20] sm:$0xff] }
  0x12   :  { %71 = vadd.xlane.f32.xlu0 %v70_v16  ;;  %v112_v47 = vadd.f32 %v668_v46, %v666_v45  ;;  %v138_v48 = vld [vmem:[%s751_s1 + $0x38] sm:$0xff]  ;;  %v133_v59 = vld [vmem:[%s751_s1 + $0x10] sm:$0xff]  ;;  %v132_v60 = vld [vmem:[%s751_s1 + $0x8] sm:$0xff] }
  0x13   :  { %98 = vadd.xlane.f32.xlu2 %v97_v17  ;;  %214 = vmatpush.msra.mxu0 %v138_v48  ;;  %v134_v55 = vld [vmem:[%s751_s1 + $0x18] sm:$0xff]  ;;  %v131_v61 = vld [vmem:[%s751_s1] sm:$0xff] }
  0x15   :  { %215 = vmatpush.msra.mxu0 %v137_v52 }
  0x17   :  { %216 = vmatpush.msra.mxu0 %v136_v53 }
  0x19   :  { %101 = vadd.xlane.f32.xlu1 %v100_v24  ;;  %217 = vmatpush.msra.mxu0 %v135_v54  ;;  %v158_v24 = vadd.s32 4294967288, %v156_v8 }
  0x1a   :  { %77 = vadd.xlane.f32.xlu0 %v76_v25 }
  0x1b   :  { %80 = vadd.xlane.f32.xlu2 %v79_v26  ;;  %218 = vmatpush.msra.mxu0 %v134_v55 }
  0x1d   :  { %219 = vmatpush.msra.mxu0 %v133_v59 }
  0x1f   :  { %220 = vmatpush.msra.mxu0 %v132_v60  ;;  %v170_v60 = vadd.s32 4294967264, %v156_v8 }
  0x21   :  { %83 = vadd.xlane.f32.xlu1 %v82_v33  ;;  %221 = vmatpush.msra.mxu0 %v131_v61 }
  0x22   :  { %104 = vadd.xlane.f32.xlu0 %v103_v34 }
  0x23   :  { %107 = vadd.xlane.f32.xlu2 %v106_v35  ;;  %v162_v35 = vadd.s32 4294967280, %v156_v8 }
  0x29   :  { %110 = vadd.xlane.f32.xlu1 %v109_v42 }
  0x2a   :  { %86 = vadd.xlane.f32.xlu0 %v85_v43 }
  0x2b   :  { %89 = vadd.xlane.f32.xlu2 %v88_v44  ;;  %v166_v44 = vadd.s32 4294967272, %v156_v8 }
  0x32   :  { %113 = vadd.xlane.f32.xlu0 %v112_v47 }
  0x7c   :  { %v93_v49 = vpop.xlane.xlu1 %92 }
  0x7d   :  { %v69_v50 = vpop.xlane.xlu0 %68  ;;  %v123_v26 = vmul.f32 0.00390625, %v93_v49 }
  0x7e   :  { %v75_v51 = vpop.xlane.xlu2 %74  ;;  %v115_v33 = vmul.f32 0.00390625, %v69_v50 }
  0x7f   :  { %v117_v42 = vmul.f32 0.00390625, %v75_v51  ;;  %v186_v52 = vperm.slane %v123_v26, %v156_v8 }
  0x80   :  { %v157_v53 = vperm.slane %v115_v33, %v156_v8 }
  0x81   :  { %v163_v59 = vperm.slane %v117_v42, %v162_v35 }
  0x84   :  { %v96_v56 = vpop.xlane.xlu1 %95 }
  0x85   :  { %v72_v57 = vpop.xlane.xlu0 %71  ;;  %v124_v34 = vmul.f32 0.00390625, %v96_v56  ;;  %v174_v56 = vadd.s32 4294967256, %v156_v8 }
  0x86   :  { %v99_v58 = vpop.xlane.xlu2 %98  ;;  %v116_v25 = vmul.f32 0.00390625, %v72_v57 }
  0x87   :  { %v125_v48 = vmul.f32 0.00390625, %v99_v58  ;;  %v187_v54 = vperm.slane %v124_v34, %v158_v24 }
  0x88   :  { %v159_v43 = vperm.slane %v116_v25, %v158_v24 }
  0x89   :  { %v189_v32 = vperm.slane %v125_v48, %v162_v35  ;;  %v188_v26 = vsel %vm160_vm0, %v187_v54, %v186_v52 }
  0x8a   :  { %v161_v49 = vsel %vm160_vm0, %v159_v43, %v157_v53 }
  0x8b   :  { %v190_v35 = vsel %vm164_vm1, %v189_v32, %v188_v26  ;;  %v760_v26 = vlaneseq }
  0x8c   :  { %v102_v62 = vpop.xlane.xlu1 %101 }
  0x8d   :  { %v78_v63 = vpop.xlane.xlu0 %77  ;;  %v126_v55 = vmul.f32 0.00390625, %v102_v62 }
  0x8e   :  { %v81_v3 = vpop.xlane.xlu2 %80  ;;  %v118_v47 = vmul.f32 0.00390625, %v78_v63  ;;  %v178_v63 = vadd.s32 4294967248, %v156_v8 }
  0x8f   :  { %v119_v61 = vmul.f32 0.00390625, %v81_v3  ;;  %v191_v24 = vperm.slane %v126_v55, %v166_v44  ;;  %v165_v3 = vsel %vm164_vm1, %v163_v59, %v161_v49 }
  0x90   :  { %v167_v50 = vperm.slane %v118_v47, %v166_v44 }
  0x91   :  { %v192_v53 = vsel %vm168_vm2, %v191_v24, %v190_v35  ;;  %v281_v24 = vshrl.u32 %v760_v26, 7 }
  0x92   :  { %v169_v42 = vsel %vm168_vm2, %v167_v50, %v165_v3 }
  0x93   :  { %468 = vset.pattern.permute.xlu1 %v281_v24  ;;  %v288_v3 = vadd.s32 8, %v281_v24 }
  0x94   :  { %v84_v15 = vpop.xlane.xlu1 %83 }
  0x95   :  { %v105_v16 = vpop.xlane.xlu0 %104  ;;  %v120_v51 = vmul.f32 0.00390625, %v84_v15  ;;  %v182_v15 = vadd.s32 4294967240, %v156_v8  ;;  %469 = vset.pattern.permute.xlu2 %v288_v3 }
  0x96   :  { %v108_v17 = vpop.xlane.xlu2 %107  ;;  %v127_v7 = vmul.f32 0.00390625, %v105_v16  ;;  %v171_v16 = vperm.slane %v119_v61, %v170_v60 }
  0x97   :  { %v128_v62 = vmul.f32 0.00390625, %v108_v17  ;;  %v175_v43 = vperm.slane %v120_v51, %v174_v56  ;;  %v228_v51 = vstv %s753_s3 }
  0x98   :  { %v193_v33 = vperm.slane %v127_v7, %v170_v60  ;;  %v173_v17 = vsel %vm172_vm3, %v171_v16, %v169_v42 }
  0x99   :  { %v195_v52 = vperm.slane %v128_v62, %v174_v56  ;;  %v177_v55 = vsel %vm176_vm4, %v175_v43, %v173_v17  ;;  %v231_v56 = vld [vmem:[%s752_s2] sm:$0xf]  ;;  %v294_v62 = vadd.s32 16, %v281_v24  ;;  %s544_s2 = smov [#allocation6]  }
  0x9a   :  { %v194_v44 = vsel %vm172_vm3, %v193_v33, %v192_v53  ;;  %461 = vmatpush.msk.msra.mxu1 %vm236_vm9, %v231_v56  ;;  %s445_s3 = sshll.u32 %s544_s2, 4  ;;  %s446_s3 = int_to_ptr.vmem [resolvable:$true] %s445_s3 }
  0x9b   :  { %v196_v8 = vsel %vm176_vm4, %v195_v52, %v194_v44  ;;  %470 = vset.pattern.permute.xlu0 %v294_v62 }
  0x9c   :  { %v111_v25 = vpop.xlane.xlu1 %110 }
  0x9d   :  { %v87_v57 = vpop.xlane.xlu0 %86  ;;  %v129_v34 = vmul.f32 0.00390625, %v111_v25 }
  0x9e   :  { %v121_v31 = vmul.f32 0.00390625, %v87_v57  ;;  %v90_v58 = vpop.xlane.xlu2 %89 }
  0x9f   :  { %v122_v47 = vmul.f32 0.00390625, %v90_v58  ;;  %v197_v54 = vperm.slane %v129_v34, %v178_v63 }
  0xa0   :  { %v179_v48 = vperm.slane %v121_v31, %v178_v63 }
  0xa1   :  { %v183_v59 = vperm.slane %v122_v47, %v182_v15  ;;  %v198_v32 = vsel %vm180_vm5, %v197_v54, %v196_v8  ;;  %v312_v8 = vadd.s32 40, %v281_v24 }
  0xa2   :  { %v181_v61 = vsel %vm180_vm5, %v179_v48, %v177_v55  ;;  %v300_v55 = vadd.s32 24, %v281_v24 }
  0xa3   :  { %v185_v31 = vsel %vm184_vm6, %v183_v59, %v181_v61  ;;  %v306_v59 = vadd.s32 32, %v281_v24  ;;  %v318_v61 = vadd.s32 48, %v281_v24 }
  0xa5   :  { %v114_v7 = vpop.xlane.xlu0 %113 }
  0xa6   :  { %v130_v60 = vmul.f32 0.00390625, %v114_v7 }
  0xa8   :  { %v199_v57 = vperm.slane %v130_v60, %v182_v15 }
  0xaa   :  { %v200_v49 = vsel %vm184_vm6, %v199_v57, %v198_v32  ;;  %v324_v57 = vadd.s32 56, %v281_v24 }
  0xab   :  { %v202_v50 = vsel %vm201_vm7, %v200_v49, %v185_v31 }
  0xac   :  { %460 = vmatmul.msk.f32.vlgmr.msra.gmra.mxu0 %vm203_vm8, %v202_v50 }
 0x129   :  { %v223_v25 = vpop.f32.mrf.mxu0 }
 0x12a   :  { %vm227_vm10 = vcmp.ge.f32.partialorder %v223_v25, 0.0  ;;  %v229_v63 = vmul.f32 %v228_v51, %v223_v25 }
 0x12c   :  { %v230_v58 = vsel %vm227_vm10, %v223_v25, %v229_v63 }
 0x12d   :  { %462 = vmatmul.msk.f32.vlgmr.msra.gmra.mxu1 %vm232_vm11, %v230_v58 }
 0x1aa   :  { %v257_v16 = vpop.f32.mrf.mxu1 }
 0x1ab   :  { %v463_v33 = vmul.f32 -1.442695, %v257_v16 }
 0x1ad   :  { %485 = vpow2.f32 %v463_v33 }
 0x1b3   :  { %v486_v34 = vpop.eup %485 }
 0x1b4   :  { %v263_v42 = vadd.f32 1.0, %v486_v34 }
 0x1b6   :  { %487 = vrcp.f32 %v263_v42  ;;  %v275_v35 = vand.u32 2147483648, %v263_v42  ;;  %v273_v53 = vand.u32 2147483647, %v263_v42  ;;  %vm269_vm13 = vweird.f32 %v263_v42 }
 0x1b8   :  { %v276_v17 = vor.u32 1.1754944e-38, %v275_v35  ;;  %vm274_vm15 = vcmp.eq.f32.partialorder %v273_v53, 8.507059e+37 }
 0x1bc   :  { %v488_v43 = vpop.eup %487 }
 0x1bd   :  { %v265_v15 = vmul.f32 %v488_v43, %v263_v42  ;;  %vm270_vm12 = vweird.f32 %v488_v43 }
 0x1be   :  { %vm271_vm14 = vmor %vm269_vm13, %vm270_vm12 }
 0x1bf   :  { %v266_v47 = vsub.f32 1.0, %v265_v15 }
 0x1c1   :  { %v267_v48 = vmul.f32 %v488_v43, %v266_v47 }
 0x1c3   :  { %v268_v52 = vadd.f32 %v488_v43, %v267_v48  ;;  %v762_v48 = vld [vmem:[#allocation10_spill] sm:$0xff] }
 0x1c5   :  { %v272_v44 = vsel %vm271_vm14, %v488_v43, %v268_v52 }
 0x1c6   :  { %v277_v54 = vsel %vm274_vm15, %v276_v17, %v272_v44 }
 0x1c7   :  { %v279_v7 = vperm.slane %v277_v54, 0  ;;  %v328_v60 = vperm.slane %v277_v54, 1 }
 0x1c9   :  { %296 = vperm.xlu0 %470, %v279_v7   ;;  %290 = vperm.xlu2 %469, %v279_v7  }
 0x1ca   :  { %284 = vperm.xlu1 %468, %v279_v7  }
 0x1d1   :  { %477 = vset.pattern.permute.xlu0 %v288_v3  ;;  %471 = vset.pattern.permute.xlu2 %v300_v55 }
 0x1d2   :  { %472 = vset.pattern.permute.xlu1 %v306_v59 }
 0x1d9   :  { %339 = vperm.xlu0 %477, %v328_v60   ;;  %302 = vperm.xlu2 %471, %v279_v7  }
 0x1da   :  { %308 = vperm.xlu1 %472, %v279_v7  }
 0x1e1   :  { %482 = vset.pattern.permute.xlu0 %v318_v61  ;;  %473 = vset.pattern.permute.xlu2 %v312_v8 }
 0x1e2   :  { %474 = vset.pattern.permute.xlu1 %v318_v61 }
 0x1e9   :  { %369 = vperm.xlu0 %482, %v328_v60   ;;  %314 = vperm.xlu2 %473, %v279_v7  }
 0x1ea   :  { %320 = vperm.xlu1 %474, %v279_v7  }
 0x1f1   :  { %475 = vset.pattern.permute.xlu2 %v324_v57  ;;  %484 = vset.pattern.permute.xlu0 %v324_v57 }
 0x1f2   :  { %476 = vset.pattern.permute.xlu1 %v281_v24 }
 0x1f9   :  { %326 = vperm.xlu2 %475, %v279_v7  }
 0x1fa   :  { %333 = vperm.xlu1 %476, %v328_v60  }
 0x201   :  { %478 = vset.pattern.permute.xlu2 %v294_v62 }
 0x202   :  { %479 = vset.pattern.permute.xlu1 %v300_v55 }
 0x209   :  { %345 = vperm.xlu2 %478, %v328_v60  }
 0x20a   :  { %351 = vperm.xlu1 %479, %v328_v60  }
 0x211   :  { %480 = vset.pattern.permute.xlu2 %v306_v59 }
 0x212   :  { %481 = vset.pattern.permute.xlu1 %v312_v8 }
 0x219   :  { %357 = vperm.xlu2 %480, %v328_v60  }
 0x21a   :  { %363 = vperm.xlu1 %481, %v328_v60  }
 0x221   :  { %483 = vset.pattern.permute.xlu2 %v324_v57 }
 0x223   :  { %v291_v32 = vpop.permute.xlu2 %290 }
 0x224   :  { %v379_v31 = vmul.f32 %v291_v32, %v598_v11  ;;  %v380_v49 = vmul.f32 %v291_v32, %v600_v12 }
 0x226   :  { %411 = vst [vmem:[#allocation6 + $0x10] sm:$0xff] %v379_v31 }
 0x227   :  { %412 = vst [vmem:[#allocation6 + $0x18] sm:$0xff] %v380_v49 }
 0x229   :  { %375 = vperm.xlu2 %483, %v328_v60  }
 0x233   :  { %v303_v50 = vpop.permute.xlu2 %302 }
 0x234   :  { %v383_v56 = vmul.f32 %v303_v50, %v616_v20  ;;  %v384_v51 = vmul.f32 %v303_v50, %v618_v21 }
 0x236   :  { %415 = vst [vmem:[#allocation6 + $0x30] sm:$0xff] %v383_v56 }
 0x237   :  { %416 = vst [vmem:[#allocation6 + $0x38] sm:$0xff] %v384_v51 }
 0x23b   :  { %v297_v25 = vpop.permute.xlu0 %296 }
 0x23c   :  { %v381_v63 = vmul.f32 %v297_v25, %v586_v5  ;;  %v382_v58 = vmul.f32 %v297_v25, %v588_v6  ;;  %v285_v26 = vpop.permute.xlu1 %284 }
 0x23d   :  { %v377_v11 = vmul.f32 %v285_v26, %v580_v2  ;;  %v378_v12 = vmul.f32 %v285_v26, %v584_v4 }
 0x23e   :  { %413 = vst [vmem:[#allocation6 + $0x20] sm:$0xff] %v381_v63 }
 0x23f   :  { %414 = vst [vmem:[#allocation6 + $0x28] sm:$0xff] %v382_v58 }
 0x240   :  { %409 = vst [vmem:[#allocation6] sm:$0xff] %v377_v11 }
 0x241   :  { %410 = vst [vmem:[#allocation6 + $0x8] sm:$0xff] %v378_v12 }
 0x243   :  { %v315_v24 = vpop.permute.xlu2 %314 }
 0x244   :  { %v387_v20 = vmul.f32 %v315_v24, %v630_v27  ;;  %v388_v21 = vmul.f32 %v315_v24, %v632_v28 }
 0x246   :  { %419 = vst [vmem:[#allocation6 + $0x50] sm:$0xff] %v387_v20 }
 0x247   :  { %420 = vst [vmem:[#allocation6 + $0x58] sm:$0xff] %v388_v21 }
 0x24b   :  { %v340_v62 = vpop.permute.xlu0 %339 }
 0x24c   :  { %v395_v5 = vmul.f32 %v340_v62, %v594_v9  ;;  %v396_v6 = vmul.f32 %v340_v62, %v596_v10  ;;  %v309_v3 = vpop.permute.xlu1 %308 }
 0x24d   :  { %v385_v2 = vmul.f32 %v309_v3, %v620_v22  ;;  %v386_v4 = vmul.f32 %v309_v3, %v622_v23 }
 0x24e   :  { %427 = vst [vmem:[#allocation6 + $0x90] sm:$0xff] %v395_v5 }
 0x24f   :  { %428 = vst [vmem:[#allocation6 + $0x98] sm:$0xff] %v396_v6 }
 0x250   :  { %417 = vst [vmem:[#allocation6 + $0x40] sm:$0xff] %v385_v2 }
 0x251   :  { %418 = vst [vmem:[#allocation6 + $0x48] sm:$0xff] %v386_v4 }
 0x253   :  { %v327_v16 = vpop.permute.xlu2 %326 }
 0x254   :  { %v391_v27 = vmul.f32 %v327_v16, %v656_v40  ;;  %v392_v28 = vmul.f32 %v327_v16, %v658_v41 }
 0x256   :  { %423 = vst [vmem:[#allocation6 + $0x70] sm:$0xff] %v391_v27 }
 0x257   :  { %424 = vst [vmem:[#allocation6 + $0x78] sm:$0xff] %v392_v28 }
 0x25b   :  { %v370_v33 = vpop.permute.xlu0 %369 }
 0x25c   :  { %v405_v9 = vmul.f32 %v370_v33, %v648_v36  ;;  %v406_v10 = vmul.f32 %v370_v33, %v650_v37  ;;  %v321_v34 = vpop.permute.xlu1 %320 }
 0x25d   :  { %v389_v22 = vmul.f32 %v321_v34, %v652_v38  ;;  %v390_v23 = vmul.f32 %v321_v34, %v654_v39 }
 0x25e   :  { %437 = vst [vmem:[#allocation6 + $0xe0] sm:$0xff] %v405_v9 }
 0x25f   :  { %438 = vst [vmem:[#allocation6 + $0xe8] sm:$0xff] %v406_v10 }
 0x260   :  { %421 = vst [vmem:[#allocation6 + $0x60] sm:$0xff] %v389_v22 }
 0x261   :  { %422 = vst [vmem:[#allocation6 + $0x68] sm:$0xff] %v390_v23 }
 0x263   :  { %v346_v42 = vpop.permute.xlu2 %345 }
 0x264   :  { %v397_v40 = vmul.f32 %v346_v42, %v602_v13  ;;  %v398_v41 = vmul.f32 %v346_v42, %v604_v14 }
 0x266   :  { %429 = vst [vmem:[#allocation6 + $0xa0] sm:$0xff] %v397_v40 }
 0x267   :  { %430 = vst [vmem:[#allocation6 + $0xa8] sm:$0xff] %v398_v41 }
 0x26c   :  { %v334_v43 = vpop.permute.xlu1 %333 }
 0x26d   :  { %v393_v36 = vmul.f32 %v334_v43, %v576_v0  ;;  %v394_v37 = vmul.f32 %v334_v43, %v578_v1 }
 0x26f   :  { %425 = vst [vmem:[#allocation6 + $0x80] sm:$0xff] %v393_v36 }
 0x270   :  { %426 = vst [vmem:[#allocation6 + $0x88] sm:$0xff] %v394_v37 }
 0x273   :  { %v358_v38 = vpop.permute.xlu2 %357 }
 0x274   :  { %v401_v39 = vmul.f32 %v358_v38, %v634_v29  ;;  %v402_v15 = vmul.f32 %v358_v38, %v636_v30  ;;  %v761_v30 = vld [vmem:[#allocation9_spill] sm:$0xff] }
 0x276   :  { %433 = vst [vmem:[#allocation6 + $0xc0] sm:$0xff] %v401_v39 }
 0x277   :  { %434 = vst [vmem:[#allocation6 + $0xc8] sm:$0xff] %v402_v15 }
 0x27c   :  { %v352_v47 = vpop.permute.xlu1 %351 }
 0x27d   :  { %v399_v13 = vmul.f32 %v352_v47, %v612_v18  ;;  %v400_v14 = vmul.f32 %v352_v47, %v614_v19 }
 0x27f   :  { %431 = vst [vmem:[#allocation6 + $0xb0] sm:$0xff] %v399_v13 }
 0x280   :  { %432 = vst [vmem:[#allocation6 + $0xb8] sm:$0xff] %v400_v14 }
 0x283   :  { %v376_v35 = vpop.permute.xlu2 %375 }
 0x284   :  { %v407_v0 = vmul.f32 %v376_v35, %v666_v45  ;;  %v408_v1 = vmul.f32 %v376_v35, %v668_v46 }
 0x286   :  { %439 = vst [vmem:[#allocation6 + $0xf0] sm:$0xff] %v407_v0 }
 0x287   :  { %440 = vst [vmem:[#allocation6 + $0xf8] sm:$0xff] %v408_v1 }
 0x28c   :  { %v364_v29 = vpop.permute.xlu1 %363 }
 0x28d   :  { %v403_v18 = vmul.f32 %v364_v29, %v761_v30  ;;  %v404_v19 = vmul.f32 %v364_v29, %v762_v48 }
 0x28f   :  { %435 = vst [vmem:[#allocation6 + $0xd0] sm:$0xff] %v403_v18 }
 0x290   :  { %436 = vst [vmem:[#allocation6 + $0xd8] sm:$0xff] %v404_v19 }
 0x291   :  { %453 = dma.vmem_to_hbm [thread:$0]  %s446_s3, 4096, %s448_s16, [#allocation5], %s542_s20, %s542_s20, %s543_s21  }
 0x292   :  { %539 = dma.done.wait [#allocation5], 4096  }
 0x293   :  { %540 = vsyncadd [#allocation5], 4294963200 }
 0x294   :  { %458 = vsyncpa [#allocation4], 1 }
 0x295   :  { %459 = vsyncpa [#allocation5], 1 }

</bundles_post_ra>
